<compile_context>
chip_gen: v6e
topology: v6e:2x2x1
jax: 0.10.0
libtpu: 0.0.40
codegen_flags: <defaults>
</compile_context>

<pallas_src>
import functools

import jax
import jax.numpy as jnp
from jax import lax
from jax.experimental import pallas as pl
from jax.experimental.pallas import tpu as pltpu


def _drop_threshold(p: float) -> int:
    """uint32 threshold: keep an entry iff its random bits >= threshold."""
    t = int(round(float(p) * (2 ** 32)))
    return max(0, min(t, 2 ** 32 - 1))


def _weight_drop_linear_kernel(x_ref, w_ref, bits_ref, b_ref, y_ref, acc_ref,
                               *, drop_threshold):
    k = pl.program_id(2)

    @pl.when(k == 0)
    def _():
        acc_ref[...] = jnp.zeros_like(acc_ref)

    # --- DropConnect mask, integer-domain test + select -----------------
    keep = bits_ref[...] >= jnp.uint32(drop_threshold)
    w_masked = jnp.where(keep, w_ref[...], jnp.zeros_like(w_ref))

    # --- y_tile += x_tile(tm,tk) . w_tile(tn,tk), contracting IN --------
    acc_ref[...] += lax.dot_general(
        x_ref[...], w_masked,
        dimension_numbers=(((1,), (1,)), ((), ())),
        preferred_element_type=jnp.float32)

    @pl.when(k == pl.num_programs(2) - 1)
    def _():
        y_ref[...] = (acc_ref[...] + b_ref[...].astype(jnp.float32)).astype(
            y_ref.dtype)


def weight_drop_linear(x, w_raw, b, *, dropout, mask_key,
                       tm=128, tn=128, tk=256):
    """Pallas-backed forward of WeightDrop(nn.Linear, ['weight'], dropout)."""
    B, IN = x.shape
    OUT, IN2 = w_raw.shape
    assert IN == IN2, "x / weight inner-dim mismatch"

    tm = min(tm, B)
    tn = min(tn, OUT)
    tk = min(tk, IN)
    assert B % tm == 0 and OUT % tn == 0 and IN % tk == 0, \
        "shapes must be divisible by the tile sizes"

    # One uint32 of randomness per weight entry (same array feeds every batch
    # tile, so the per-weight-tile mask is consistent across grid revisits).
    bits = jax.random.bits(mask_key, (OUT, IN), dtype=jnp.uint32)
    b2 = b.reshape(1, OUT)

    grid = (B // tm, OUT // tn, IN // tk)
    kernel = functools.partial(
        _weight_drop_linear_kernel, drop_threshold=_drop_threshold(dropout))

    cost = pl.CostEstimate(
        flops=2 * B * IN * OUT,
        transcendentals=0,
        bytes_accessed=(x.size * x.dtype.itemsize
                        + w_raw.size * w_raw.dtype.itemsize
                        + bits.size * 4
                        + b2.size * b2.dtype.itemsize
                        + B * OUT * x.dtype.itemsize))

    return pl.pallas_call(
        kernel,
        out_shape=jax.ShapeDtypeStruct((B, OUT), x.dtype),
        grid_spec=pltpu.PrefetchScalarGridSpec(
            num_scalar_prefetch=0,
            grid=grid,
            in_specs=[
                pl.BlockSpec((tm, tk), lambda i, j, k: (i, k)),   # x
                pl.BlockSpec((tn, tk), lambda i, j, k: (j, k)),   # raw weight
                pl.BlockSpec((tn, tk), lambda i, j, k: (j, k)),   # mask bits
                pl.BlockSpec((1, tn), lambda i, j, k: (0, j)),    # bias
            ],
            out_specs=pl.BlockSpec((tm, tn), lambda i, j, k: (i, j)),
            scratch_shapes=[pltpu.VMEM((tm, tn), jnp.float32)],
        ),
        compiler_params=pltpu.CompilerParams(
            dimension_semantics=("parallel", "parallel", "arbitrary")),
        cost_estimate=cost,
    )(x, w_raw, bits, b2)


class WeightDropLinear:
    """JAX analogue of WeightDrop(nn.Linear(in, out), ['weight'], dropout)."""

    def __init__(self, in_features, out_features, dropout=0.0, key=None):
        self.dropout = float(dropout)
        k_w, k_b = jax.random.split(key)
        bound = 1.0 / jnp.sqrt(jnp.float32(in_features))
        self.weight_raw = jax.random.uniform(
            k_w, (out_features, in_features), jnp.float32, -bound, bound)
        self.bias = jax.random.uniform(
            k_b, (out_features,), jnp.float32, -bound, bound)

    def forward(self, x, *, mask_key):
        # _setweights() (DropConnect) + module.forward(), fused in one kernel.
        return weight_drop_linear(
            x, self.weight_raw, self.bias,
            dropout=self.dropout, mask_key=mask_key)


if __name__ == "__main__":
    key = jax.random.PRNGKey(0)
    k_x, k_mod, k_mask = jax.random.split(key, 3)

    # Tile-friendly small shapes: grid = (1, 2, 2).
    B, IN, OUT = 128, 512, 256
    x = jax.random.normal(k_x, (B, IN), jnp.float32)

    # --- p = 0: mask is all ones -> plain linear -------------------------
    mod0 = WeightDropLinear(IN, OUT, dropout=0.0, key=k_mod)
    y0 = jax.block_until_ready(mod0.forward(x, mask_key=k_mask))
    y0_ref = x @ mod0.weight_raw.T + mod0.bias[None, :]
    assert y0.shape == (B, OUT)
    assert jnp.allclose(y0, y0_ref, atol=1e-3, rtol=1e-3), "p=0 mismatch"

    # --- p = 0.5: binary {0,1} mask (kept weights NOT rescaled) ----------
    p = 0.5
    mod = WeightDropLinear(IN, OUT, dropout=p, key=k_mod)
    y = jax.block_until_ready(mod.forward(x, mask_key=k_mask))

    bits_ref = jax.random.bits(k_mask, (OUT, IN), dtype=jnp.uint32)
    keep_ref = bits_ref >= jnp.uint32(_drop_threshold(p))
    w_masked_ref = jnp.where(keep_ref, mod.weight_raw, 0.0)
    y_ref = x @ w_masked_ref.T + mod.bias[None, :]

    assert y.shape == (B, OUT) and bool(jnp.all(jnp.isfinite(y)))
    assert jnp.allclose(y, y_ref, atol=1e-3, rtol=1e-3), "p=0.5 mismatch"
    keep_frac = float(jnp.mean(keep_ref.astype(jnp.float32)))
    assert abs(keep_frac - (1.0 - p)) < 0.05, "unexpected drop rate"

    print("KERNEL_OK")
</pallas_src>

<mosaic_0001>
module attributes {stable_mosaic.version = 11 : i64} {
  func.func @_weight_drop_linear_kernel(%arg0: i32, %arg1: i32, %arg2: i32, %arg3: memref<128x256xf32, #tpu.memory_space<vmem>>, %arg4: memref<128x256xf32, #tpu.memory_space<vmem>>, %arg5: memref<128x256xi32, #tpu.memory_space<vmem>>, %arg6: memref<1x128xf32, #tpu.memory_space<vmem>>, %arg7: memref<128x128xf32, #tpu.memory_space<vmem>>, %arg8: memref<128x128xf32, #tpu.memory_space<vmem>>) attributes {dimension_semantics = [#tpu.dimension_semantics<parallel>, #tpu.dimension_semantics<parallel>, #tpu.dimension_semantics<arbitrary>], iteration_bounds = array<i64: 1, 2, 2>, scalar_prefetch = 0 : i64, scratch_operands = 1 : i64, tpu.core_type = #tpu.core_type<tc>, window_params = [{transform_indices = @transform_0, window_bounds = array<i64: 128, 256>}, {transform_indices = @transform_1, window_bounds = array<i64: 128, 256>}, {transform_indices = @transform_2, window_bounds = array<i64: 128, 256>}, {transform_indices = @transform_3, window_bounds = array<i64: 1, 128>}, {transform_indices = @transform_4, window_bounds = array<i64: 128, 128>}]} {
    %c0_i32 = arith.constant 0 : i32
    %0 = arith.cmpi eq, %arg2, %c0_i32 : i32
    %1 = arith.extui %0 : i1 to i32
    %c0_i32_0 = arith.constant 0 : i32
    %2 = arith.cmpi ne, %1, %c0_i32_0 : i32
    scf.if %2 {
      %cst_13 = arith.constant 0.000000e+00 : f32
      %17 = vector.broadcast %cst_13 : f32 to vector<128x128xf32>
      %c0_14 = arith.constant 0 : index
      %c0_15 = arith.constant 0 : index
      %18 = vector.load %arg8[%c0_14, %c0_15] : memref<128x128xf32, #tpu.memory_space<vmem>>, vector<128x128xf32>
      tpu.vector_store %arg8[%c0_14, %c0_15], %17 {strides = array<i32>} : memref<128x128xf32, #tpu.memory_space<vmem>>, vector<128x128xf32>,
    } else {
    }
    %c0 = arith.constant 0 : index
    %c0_1 = arith.constant 0 : index
    %3 = vector.load %arg5[%c0, %c0_1] : memref<128x256xi32, #tpu.memory_space<vmem>>, vector<128x256xi32>
    %c0_i32_2 = arith.constant 0 : i32
    %4 = vector.broadcast %c0_i32_2 : i32 to vector<128x256xi32>
    %5 = arith.cmpi uge, %3, %4 : vector<128x256xi32>
    %c0_3 = arith.constant 0 : index
    %c0_4 = arith.constant 0 : index
    %6 = vector.load %arg4[%c0_3, %c0_4] : memref<128x256xf32, #tpu.memory_space<vmem>>, vector<128x256xf32>
    %cst = arith.constant 0.000000e+00 : f32
    %7 = vector.broadcast %cst : f32 to vector<128x256xf32>
    %8 = arith.select %5, %6, %7 : vector<128x256xi1>, vector<128x256xf32>
    %c0_5 = arith.constant 0 : index
    %c0_6 = arith.constant 0 : index
    %9 = vector.load %arg8[%c0_5, %c0_6] : memref<128x128xf32, #tpu.memory_space<vmem>>, vector<128x128xf32>
    %c0_7 = arith.constant 0 : index
    %c0_8 = arith.constant 0 : index
    %10 = vector.load %arg3[%c0_7, %c0_8] : memref<128x256xf32, #tpu.memory_space<vmem>>, vector<128x256xf32>
    %cst_9 = arith.constant dense<0.000000e+00> : vector<128x128xf32>
    %11 = tpu.matmul %10, %8, %cst_9 {dimension_numbers = #tpu.dot_dimension_numbers<[1], [1], [0], [0], [0, 0, 1, 0], [], []>} : vector<128x256xf32>, vector<128x256xf32>, vector<128x128xf32> -> vector<128x128xf32>
    %12 = arith.addf %9, %11 : vector<128x128xf32>
    %c0_10 = arith.constant 0 : index
    %c0_11 = arith.constant 0 : index
    %13 = vector.load %arg8[%c0_10, %c0_11] : memref<128x128xf32, #tpu.memory_space<vmem>>, vector<128x128xf32>
    tpu.vector_store %arg8[%c0_10, %c0_11], %12 {strides = array<i32>} : memref<128x128xf32, #tpu.memory_space<vmem>>, vector<128x128xf32>,
    %c1_i32 = arith.constant 1 : i32
    %14 = arith.cmpi eq, %arg2, %c1_i32 : i32
    %15 = arith.extui %14 : i1 to i32
    %c0_i32_12 = arith.constant 0 : i32
    %16 = arith.cmpi ne, %15, %c0_i32_12 : i32
    scf.if %16 {
      %c0_13 = arith.constant 0 : index
      %c0_14 = arith.constant 0 : index
      %17 = vector.load %arg8[%c0_13, %c0_14] : memref<128x128xf32, #tpu.memory_space<vmem>>, vector<128x128xf32>
      %c0_15 = arith.constant 0 : index
      %c0_16 = arith.constant 0 : index
      %18 = vector.load %arg6[%c0_15, %c0_16] : memref<1x128xf32, #tpu.memory_space<vmem>>, vector<1x128xf32>
      %19 = vector.broadcast %18 : vector<1x128xf32> to vector<128x128xf32>
      %20 = arith.addf %17, %19 : vector<128x128xf32>
      %c0_17 = arith.constant 0 : index
      %c0_18 = arith.constant 0 : index
      %21 = vector.load %arg7[%c0_17, %c0_18] : memref<128x128xf32, #tpu.memory_space<vmem>>, vector<128x128xf32>
      tpu.vector_store %arg7[%c0_17, %c0_18], %20 {strides = array<i32>} : memref<128x128xf32, #tpu.memory_space<vmem>>, vector<128x128xf32>,
    } else {
    }
    return
  }
  func.func @transform_0(%arg0: i32, %arg1: i32, %arg2: i32) -> (i32, i32) {
    %c0_i32 = arith.constant 0 : i32
    return %arg0, %arg2 : i32, i32
  }
  func.func @transform_1(%arg0: i32, %arg1: i32, %arg2: i32) -> (i32, i32) {
    %c0_i32 = arith.constant 0 : i32
    return %arg1, %arg2 : i32, i32
  }
  func.func @transform_2(%arg0: i32, %arg1: i32, %arg2: i32) -> (i32, i32) {
    %c0_i32 = arith.constant 0 : i32
    return %arg1, %arg2 : i32, i32
  }
  func.func @transform_3(%arg0: i32, %arg1: i32, %arg2: i32) -> (i32, i32) {
    %c0_i32 = arith.constant 0 : i32
    %c0_i32_0 = arith.constant 0 : i32
    return %c0_i32, %arg1 : i32, i32
  }
  func.func @transform_4(%arg0: i32, %arg1: i32, %arg2: i32) -> (i32, i32) {
    %c0_i32 = arith.constant 0 : i32
    return %arg0, %arg1 : i32, i32
  }
}

</mosaic_0001>

<bundles_post_ra>
// kernel: tpu_custom_call.1
= control target key start
LH: loop header
LB: loop body
LE: loop exit
PB: predicated region body
PF: predicated region fallthrough
CT: control target
= control target key end

     0   :  { %s1915_s0 = inlined_call_operand.hbm [shape: f32[128,512], index: 0, kind: input, shape index: {}]   ;;  %s1916_s1 = inlined_call_operand.hbm [shape: f32[256,512], index: 1, kind: input, shape index: {}]   ;;  %s1917_s2 = inlined_call_operand.hbm [shape: u32[256,512], index: 2, kind: input, shape index: {}]   ;;  %s1918_s3 = inlined_call_operand.vmem [shape: f32[1,256], index: 3, kind: input, shape index: {}]   ;;  %s1919_s4 = inlined_call_operand.hbm [shape: f32[128,256], index: 4, kind: output, shape index: {}]  }
   0x1   :  { %1939 = sst [smem:[#allocation23_spill]] %s1915_s0 }
   0x2   :  { %1940 = sst [smem:[#allocation24_spill]] %s1916_s1 }
   0x3   :  { %1941 = sst [smem:[#allocation25_spill]] %s1919_s4 }
   0x4   :  { %9 = vsyncpa [#allocation4], 0 }
   0x5   :  { %11 = vsyncpa [#allocation4 + $0x1], 0 }
   0x6   :  { %12 = vsyncpa [#allocation7], 0 }
   0x7   :  { %14 = vsyncpa [#allocation7 + $0x1], 0 }
   0x8   :  { %15 = vsyncpa [#allocation5], 0 }
   0x9   :  { %17 = vsyncpa [#allocation5 + $0x1], 0  ;;  %s1457_s15 = smov 0   ;;  %s1459_s16 = smov 0  }
   0xa   :  { %s1461_s17 = smov 0   ;;  %s1463_s18 = smov 0  }
   0xb   :  { %s1465_s19 = smov 0   ;;  %s1467_s20 = smov 0  }
   0xc   :  { %s1469_s21 = smov 0   ;;  %s1471_s22 = smov 0  }
   0xd   :  { %s1473_s23 = smov 0   ;;  %s1475_s24 = smov 0  }
   0xe   :  { %s1477_s25 = smov 0   ;;  %s1479_s26 = smov 0  }
   0xf   :  { %s1481_s27 = smov 0   ;;  %s1483_s28 = smov 0  }
  0x10 LB: > { %1942 = sst [smem:[#allocation13_spill]] %s1367_s15  ;;  %s1526_s29 = sadd.s32 4294967295, %s1419_s28   ;;  %s1419_s28 = sphi %s1483_s28, %s23_s28   ;;  %s1415_s27 = sphi %s1481_s27, %s1983_s27   ;;  %s1411_s26 = sphi %s1479_s26, %s1995_s26   ;;  %s1407_s25 = sphi %s1477_s25, %s1994_s25   ;;  %s1403_s24 = sphi %s1475_s24, %s1993_s24   ;;  %s1399_s23 = sphi %s1473_s23, %s1992_s23   ;;  %s1395_s22 = sphi %s1471_s22, %s1991_s22   ;;  %s1391_s21 = sphi %s1469_s21, %s1990_s21   ;;  %s1387_s20 = sphi %s1467_s20, %s1989_s20   ;;  %s1383_s19 = sphi %s1465_s19, %s1988_s19   ;;  %s1379_s18 = sphi %s1463_s18, %s1987_s18   ;;  %s1375_s17 = sphi %s1461_s17, %s1979_s17   ;;  %s1371_s16 = sphi %s1459_s16, %s1986_s16   ;;  %s1367_s15 = sphi %s1457_s15, %s1985_s15  }
  0x11   : > { %1943 = sst [smem:[#allocation14_spill]] %s1375_s17  ;;  %s949_s30 = sadd.s32 4294967294, %s1419_s28  }
  0x12   : > { %1944 = sst [smem:[#allocation15_spill]] %s1403_s24  ;;  %s35_s5 = sadd.s32 1, %s1411_s26 }
  0x13   : > { %1945 = sst [smem:[#allocation16_spill]] %s1415_s27  ;;  %p36_p0 = scmp.ge.s32.totalorder %s35_s5, 2 }
  0x14   : > { %s38_s6 = sadd.s32 1, %s1415_s27  ;;  %p59_p1 = scmp.eq.s32.totalorder %s1419_s28, 0 }
  0x15   : > { %p1930_p2 = scmp.eq.s32.totalorder %s1526_s29, 0  ;;  %s1997_s5 = smov (%p36_p0, %s35_s5), 0 }
  0x16   : > { %1946 = sst [smem:[#allocation17_spill]] %s1997_s5  ;;  %s1999_s6 = smov (!%p36_p0, %s38_s6), %s1415_s27 }
  0x17   : > { %s79_s7 = sadd.s32 1, %s1387_s20  ;;  %p86_p3 = scmp.ne.s32.totalorder %s1387_s20, %s1383_s19 }
  0x18   : > { %p40_p4 = scmp.ge.s32.totalorder %s1999_s6, 2  ;;  %s1541_s8 = ssub.s32 %s1411_s26, %s1997_s5 }
  0x19   : > { %p1545_p5 = por %p86_p3, %p59_p1  ;;  %p92_p6 = scmp.ne.s32.totalorder %s1383_s19, %s1379_s18 }
  0x1a   : > { %s2001_s6 = smov (%p40_p4, %s1999_s6), 0  ;;  %s161_s11 = sadd.s32 1, %s1375_s17 }
  0x1b   : > { %1948 = sst [smem:[#allocation18_spill]] %s2001_s6  ;;  %p1554_p7 = por %p92_p6, %p1930_p2 }
  0x1c   : > { %s74_s12 = ssub.s32 %s1415_s27, %s2001_s6  ;;  %p171_p8 = scmp.ne.s32.totalorder %s1375_s17, %s1371_s16 }
  0x1d   : > { %s76_s13 = sor.u32 %s74_s12, %s1541_s8  ;;  %p159_p9 = scmp.eq.s32.totalorder %s74_s12, 0 }
  0x1e   : > { %p77_p10 = scmp.eq.s32.totalorder %s76_s13, 0  ;;  %p172_p11 = scmp.eq.s32.totalorder %s1526_s29, 3 }
  0x1f   : > { %s1566_s14 = scalar_select %p159_p9, %s1375_s17, %s161_s11  }
  0x20   : > { %s1569_s18 = scalar_select %p77_p10, %s1387_s20, %s79_s7  }
  0x21   : > { %1950 = sst [smem:[#allocation19_spill]] %s1566_s14  ;;  %p1571_p12 = por %p172_p11, %p171_p8 }
  0x22   : > { %1951 = sst [smem:[#allocation20_spill]] %s1569_s18  ;;  %p177_p13 = scmp.ne.s32.totalorder %s1371_s16, %s1367_s15 }
  0x23   : > { %s1952_s5 = scalar_select %p1571_p12, 1, 0 }
  0x24   : > { %p178_p0 = scmp.eq.s32.totalorder %s949_s30, 3  ;;  %p1929_p3 = scmp.lt.s32.totalorder %s1419_s28, 4 }
  0x25   : > { %1953 = sst [smem:[#allocation21_spill]] %s1952_s5  ;;  %s222_s12 = sand.u32 1, %s1419_s28  }
  0x26   : > { %p1578_p4 = por %p178_p0, %p177_p13  ;;  %s224_s13 = sand.u32 1, %s1387_s20  }
  0x27   : > { %s1584_s11 = sshll.u32 %s224_s13, 8  ;;  %s957_s7 = sshll.u32 %s1411_s26, 1 }
  0x28   : > { %s1954_s6 = scalar_select %p1578_p4, 1, 0 }
  0x29   : > { %s1010_s18 = sshll.u32 %s1415_s27, 6  ;;  %s226_s17 = scalar_lea.vmem [#allocation6], %s1584_s11 }
  0x2a   : > { %1955 = sst [smem:[#allocation22_spill]] %s1954_s6  ;;  %s233_s14 = sadd.s32 %s1010_s18, %s957_s7 }
  0x2b   : > { %s236_s4 = sshll.u32 %s226_s17, 4  ;;  %s959_s5 = sshll.u32 %s233_s14, 7  ;;  %s237_s4 = int_to_ptr.vmem [resolvable:$true] %s236_s4 }
  0x2c   : > { %s1956_s1 = sld [smem:[#allocation24_spill]]  ;;  %p1596_p6 = pnand %p1929_p3, %p1545_p5 }
  0x2d   : > { %p49_p8 = scmp.eq.s32.totalorder %s1541_s8, 0  ;;  %s1604_s18 = scalar_lea.hbm %s1917_s2, %s959_s5 }
  0x2e   : > { %s1606_s17 = scalar_lea.sflag [#allocation7], %s222_s12  ;;  %p1931_p9 = pneg %p1596_p6 }
  0x2f   : > { %s1200_s15 = scalar_lea.vmem %s237_s4, 4096  ;;  %s1421_s24 = smov [#allocation6]  }
  0x30   : > { %p1201_p10 = scmp.ne.s32.totalorder %s237_s4, %s1200_s15  ;;  %s1205_s9 = sshll.u32 %s1421_s24, 4  ;;  %s1206_s9 = int_to_ptr.vmem [resolvable:$false] %s1205_s9 }
  0x31   : > { %s1207_s14 = scalar_lea.vmem %s1206_s9, 8192  ;;  %p1208_p13 = scmp.lt.s32.totalorder %s237_s4, %s1206_s9 }
  0x32   : > { %s235_s30 = scalar_lea.hbm %s1956_s1, %s959_s5  ;;  %p1203_p5 = pnand %p1201_p10, %p1931_p9 }
  0x33   : > { %p1209_p0 = scmp.lt.s32.totalorder %s1207_s14, %s1200_s15 }
  0x34   : > { %p1204_p11 = pneg %p1203_p5 }
  0x35   : > { %p1210_p3 = por %p1209_p0, %p1208_p13 }
  0x37   : > { %p1211_p2 = pnand %p1210_p3, %p1204_p11 }
  0x39   : > { %1214 = shalt.err (!%p1211_p2)
}
  0x3a   : > { %s1932_s27 = smov 512   ;;  %s1934_s5 = smov 256  }
  0x3b   : > { %s1936_s12 = smov 16   ;;  %s250_s7 = scalar_lea.vmem [#allocation8], %s1584_s11 }
  0x3c   : > { %1058 = dma.hbm_to_vmem [thread:$0]  (!%p1596_p6), %s235_s30, 4096, %s237_s4, %s1606_s17, %s1932_s27, %s1934_s5, %s1936_s12  }
  0x3d   : > { %s260_s13 = sshll.u32 %s250_s7, 4  ;;  %p965_p2 = scmp.ge.s32.totalorder %s1419_s28, 1  ;;  %s1655_s13 = int_to_ptr.vmem [resolvable:$true] %s260_s13 }
  0x3e   : > { %p274_p3 = scmp.lt.s32.totalorder %s1419_s28, 5  ;;  %s51_s24 = sadd.s32 1, %s1399_s23 }
  0x3f   : > { %p58_p5 = scmp.ne.s32.totalorder %s1399_s23, %s1395_s22  ;;  %p64_p13 = scmp.ne.s32.totalorder %s1395_s22, %s1391_s21 }
  0x40   : > { %p1622_p10 = pnand %p965_p2, %p274_p3  ;;  %s198_s14 = sand.u32 1, %s1399_s23  }
  0x41   : > { %s1632_s9 = scalar_select %p49_p8, %s1399_s23, %s51_s24  }
  0x42   : > { %p60_p11 = por %p59_p1, %p58_p5  ;;  %s1009_s1 = sshll.u32 %s1411_s26, 8 }
  0x43   : > { %p1959_p0 = scmp.eq.s32.totalorder %s1526_s29, 0  ;;  %s952_s11 = sshll.u32 %s198_s14, 8 }
  0x44   : > { %s1961_s0 = sld [smem:[#allocation23_spill]]  ;;  %p1962_p2 = scmp.lt.s32.totalorder %s1419_s28, 4 }
  0x45   : > { %p1642_p9 = por %p1959_p0, %p64_p13  ;;  %s202_s21 = scalar_lea.vmem [#allocation3], %s952_s11 }
  0x46   : > { %p1651_p3 = pnand %p1962_p2, %p60_p11  ;;  %s212_s24 = sshll.u32 %s202_s21, 4  ;;  %s213_s24 = int_to_ptr.vmem [resolvable:$true] %s212_s24 }
  0x47   : > { %s199_s5 = scalar_lea.sflag [#allocation4], %s198_s14  ;;  %s1228_s12 = scalar_lea.vmem %s213_s24, 4096 }
  0x48   : > { %p1217_p1 = pneg %p1651_p3  ;;  %p1229_p8 = scmp.ne.s32.totalorder %s213_s24, %s1228_s12 }
  0x49   : > { %s1425_s30 = smov [#allocation3]  }
  0x4a   : > { %s211_s27 = scalar_lea.hbm %s1961_s0, %s1009_s1  ;;  %p1231_p5 = pnand %p1229_p8, %p1217_p1 }
  0x4b   : > { %s1233_s1 = sshll.u32 %s1425_s30, 4  ;;  %s1234_s1 = int_to_ptr.vmem [resolvable:$false] %s1233_s1 }
  0x4c   : > { %p1232_p13 = pneg %p1231_p5  ;;  %s1235_s7 = scalar_lea.vmem %s1234_s1, 8192 }
  0x4d   : > { %p1236_p11 = scmp.lt.s32.totalorder %s213_s24, %s1234_s1  ;;  %p1237_p0 = scmp.lt.s32.totalorder %s1235_s7, %s1228_s12 }
  0x4f   : > { %p1238_p2 = por %p1237_p0, %p1236_p11 }
  0x51   : > { %p1239_p4 = pnand %p1238_p2, %p1232_p13 }
  0x53   : > { %1242 = shalt.err (!%p1239_p4)
}
  0x54   : > { %s1964_s11 = smov 16   ;;  %s1965_s21 = smov 256  }
  0x55   : > { %s1966_s14 = smov 512   ;;  %s1256_s0 = scalar_lea.vmem %s1655_s13, 4096 }
  0x56   : > { %1055 = dma.hbm_to_vmem [thread:$0]  (!%p1651_p3), %s211_s27, 4096, %s213_s24, %s199_s5, %s1966_s14, %s1965_s21, %s1964_s11  }
  0x57   : > { %p1257_p1 = scmp.ne.s32.totalorder %s1655_s13, %s1256_s0  ;;  %p1967_p8 = pneg %p1596_p6 }
  0x58   : > { %s1426_s12 = smov [#allocation8]  }
  0x59   : > { %p1259_p5 = pnand %p1257_p1, %p1967_p8  ;;  %s1261_s30 = sshll.u32 %s1426_s12, 4  ;;  %s1262_s30 = int_to_ptr.vmem [resolvable:$false] %s1261_s30 }
  0x5a   : > { %s1263_s1 = scalar_lea.vmem %s1262_s30, 8192  ;;  %p1264_p4 = scmp.lt.s32.totalorder %s1655_s13, %s1262_s30 }
  0x5b   : > { %p1260_p12 = pneg %p1259_p5  ;;  %p1265_p13 = scmp.lt.s32.totalorder %s1263_s1, %s1256_s0 }
  0x5d   : > { %p1266_p11 = por %p1265_p13, %p1264_p4 }
  0x5f   : > { %p1267_p0 = pnand %p1266_p11, %p1260_p12 }
  0x61   : > { %1270 = shalt.err (!%p1267_p0)
}
  0x62   : > { %1061 = dma.hbm_to_vmem [thread:$0]  (!%p1596_p6), %s1604_s18, 4096, %s1655_s13, %s1606_s17, %s1966_s14, %s1965_s21, %s1964_s11  }
  0x63   : > { %278 = sbr.rel (%p1622_p10) target bundleno = 463 (0x1cf), region = 36  ;;  %s280_s27 = sand.u32 (!%p1622_p10), 1, %s1395_s22  }
  0x64   : > { %s966_s5 = sshll.u32 (!%p1622_p10), %s280_s27, 8  ;;  %s281_s0 = scalar_lea.sflag (!%p1622_p10), [#allocation4], %s280_s27 }
  0x65   : > { %s1681_s8 = scalar_lea.vmem (!%p1622_p10), [#allocation3], %s966_s5 }
  0x68   : > { %1354 = dma.done.wait (%p1642_p9), %s281_s0, 4096  }
  0x69   : > { %1356 = vsyncadd (%p1642_p9), %s281_s0, 4294963200  ;;  %s289_s6 = sand.u32 1, %s1526_s29   ;;  %s291_s18 = sand.u32 1, %s1383_s19  }
  0x6a   : > { %s967_s17 = sshll.u32 %s291_s18, 8  ;;  %s290_s13 = scalar_lea.sflag [#allocation7], %s289_s6 }
  0x6b   : > { %s1689_s15 = scalar_lea.vmem [#allocation6], %s967_s17 }
  0x6c   : > { %1358 = dma.done.wait (%p1554_p7), %s290_s13, 8192  }
  0x6d   : > { %1360 = vsyncadd (%p1554_p7), %s290_s13, 4294959104  ;;  %s337_s4 = sand.u32 1, %s1371_s16   ;;  %p346_p12 = scmp.lt.s32.totalorder %s1407_s25, 1 }
  0x6e   : > { %s969_s24 = sshll.u32 %s337_s4, 7  ;;  %s1706_s14 = scalar_lea.vmem [#allocation8], %s967_s17 }
  0x6f   : > { %s1700_s7 = scalar_select %p346_p12, %s1407_s25, 1 }
  0x70   : > { %s1708_s12 = scalar_lea.vmem [#allocation9], %s969_s24  ;;  %s1968_s10 = sld [smem:[#allocation15_spill]] }
  0x71   : > { %s348_s21 = scalar_lea.vmem %s1918_s3, %s1700_s7 }
  0x76   : > { %p970_p7 = scmp.ne.s32.totalorder %s1968_s10, 0 }
  0x78   : > { %353 = sbr.rel (%p970_p7) target bundleno = 134 (0x86), region = 52 }
  0x7d   : > { %v1427_v0 = vmov 0.0  }
  0x7e   : > { %354 = vst [vmem:[#allocation2 + $0x30] sm:$0xff] %v1427_v0  ;;  %355 = vst [vmem:[#allocation2] sm:$0xff] %v1427_v0 }
  0x7f   : > { %356 = vst [vmem:[#allocation2 + $0x58] sm:$0xff] %v1427_v0  ;;  %357 = vst [vmem:[#allocation2 + $0x18] sm:$0xff] %v1427_v0 }
  0x80   : > { %358 = vst [vmem:[#allocation2 + $0x50] sm:$0xff] %v1427_v0  ;;  %359 = vst [vmem:[#allocation2 + $0x68] sm:$0xff] %v1427_v0 }
  0x81   : > { %360 = vst [vmem:[#allocation2 + $0x8] sm:$0xff] %v1427_v0  ;;  %361 = vst [vmem:[#allocation2 + $0x48] sm:$0xff] %v1427_v0 }
  0x82   : > { %362 = vst [vmem:[#allocation2 + $0x40] sm:$0xff] %v1427_v0  ;;  %363 = vst [vmem:[#allocation2 + $0x20] sm:$0xff] %v1427_v0 }
  0x83   : > { %364 = vst [vmem:[#allocation2 + $0x10] sm:$0xff] %v1427_v0  ;;  %365 = vst [vmem:[#allocation2 + $0x38] sm:$0xff] %v1427_v0 }
  0x84   : > { %366 = vst [vmem:[#allocation2 + $0x60] sm:$0xff] %v1427_v0  ;;  %367 = vst [vmem:[#allocation2 + $0x70] sm:$0xff] %v1427_v0 }
  0x85   : > { %368 = vst [vmem:[#allocation2 + $0x78] sm:$0xff] %v1427_v0  ;;  %369 = vst [vmem:[#allocation2 + $0x28] sm:$0xff] %v1427_v0 }
  0x86 PF: > { %v401_v1 = vld [vmem:[%s1706_s14 + $0xf8] sm:$0xff]  ;;  %v400_v3 = vld [vmem:[%s1706_s14 + $0xf0] sm:$0xff]  ;;  %v399_v5 = vld [vmem:[%s1706_s14 + $0xe8] sm:$0xff]  ;;  %s1969_s30 = sld [smem:[#allocation15_spill]] }
  0x87   : > { %v465_v2 = vld [vmem:[%s1689_s15 + $0xf8] sm:$0xff]  ;;  %vm433_vm0 = vcmp.ge.u32.totalorder %v401_v1, 0  ;;  %vm432_vm1 = vcmp.ge.u32.totalorder %v400_v3, 0  ;;  %v464_v4 = vld [vmem:[%s1689_s15 + $0xf0] sm:$0xff]  ;;  %v463_v6 = vld [vmem:[%s1689_s15 + $0xe8] sm:$0xff]  ;;  %vm431_vm2 = vcmp.ge.u32.totalorder %v399_v5, 0 }
  0x88   : > { %971 = vmatprep.subr.msk.mxu0 %vm433_vm0, %v465_v2  ;;  %1012 = vmatprep.subr.msk.mxu1 %vm433_vm0, %v465_v2  ;;  %v398_v7 = vld [vmem:[%s1706_s14 + $0xe0] sm:$0xff]  ;;  %v397_v8 = vld [vmem:[%s1706_s14 + $0xd8] sm:$0xff]  ;;  %v396_v11 = vld [vmem:[%s1706_s14 + $0xd0] sm:$0xff] }
  0x89   : > { %972 = vmatpush1.xpose.msk.msra.mxu0 %vm432_vm1, %v464_v4  ;;  %1028 = vmatpush1.xpose.msk.msra.mxu1 %vm432_vm1, %v464_v4  ;;  %vm430_vm3 = vcmp.ge.u32.totalorder %v398_v7, 0  ;;  %v462_v9 = vld [vmem:[%s1689_s15 + $0xe0] sm:$0xff]  ;;  %vm429_vm4 = vcmp.ge.u32.totalorder %v397_v8, 0  ;;  %v461_v10 = vld [vmem:[%s1689_s15 + $0xd8] sm:$0xff]  ;;  %v395_v12 = vld [vmem:[%s1706_s14 + $0xc8] sm:$0xff]  ;;  %vm428_vm5 = vcmp.ge.u32.totalorder %v396_v11, 0 }
  0x8a   : > { %973 = vmatprep.subr.msk.mxu0 %vm431_vm2, %v463_v6  ;;  %1013 = vmatprep.subr.msk.mxu1 %vm431_vm2, %v463_v6  ;;  %v460_v13 = vld [vmem:[%s1689_s15 + $0xd0] sm:$0xff]  ;;  %vm427_vm6 = vcmp.ge.u32.totalorder %v395_v12, 0  ;;  %v459_v14 = vld [vmem:[%s1689_s15 + $0xc8] sm:$0xff]  ;;  %v394_v15 = vld [vmem:[%s1706_s14 + $0xc0] sm:$0xff] }
  0x8b   : > { %v393_v16 = vld [vmem:[%s1706_s14 + $0xb8] sm:$0xff]  ;;  %vm426_vm7 = vcmp.ge.u32.totalorder %v394_v15, 0  ;;  %v458_v17 = vld [vmem:[%s1689_s15 + $0xc0] sm:$0xff]  ;;  %v392_v19 = vld [vmem:[%s1706_s14 + $0xb0] sm:$0xff] }
  0x8c   : > { %vm425_vm8 = vcmp.ge.u32.totalorder %v393_v16, 0  ;;  %v457_v18 = vld [vmem:[%s1689_s15 + $0xb8] sm:$0xff]  ;;  %v391_v20 = vld [vmem:[%s1706_s14 + $0xa8] sm:$0xff]  ;;  %vm424_vm9 = vcmp.ge.u32.totalorder %v392_v19, 0  ;;  %v456_v21 = vld [vmem:[%s1689_s15 + $0xb0] sm:$0xff]  ;;  %p1003_p6 = scmp.ne.s32.totalorder %s1969_s30, 1 }
  0x8d   : > { %974 = vmatpush1.xpose.msk.msra.mxu0 %vm430_vm3, %v462_v9  ;;  %1029 = vmatpush1.xpose.msk.msra.mxu1 %vm430_vm3, %v462_v9  ;;  %vm423_vm10 = vcmp.ge.u32.totalorder %v391_v20, 0  ;;  %v455_v22 = vld [vmem:[%s1689_s15 + $0xa8] sm:$0xff]  ;;  %v390_v23 = vld [vmem:[%s1706_s14 + $0xa0] sm:$0xff]  ;;  %v389_v24 = vld [vmem:[%s1706_s14 + $0x98] sm:$0xff] }
  0x8e   : > { %975 = vmatprep.subr.msk.mxu0 %vm429_vm4, %v461_v10  ;;  %1014 = vmatprep.subr.msk.mxu1 %vm429_vm4, %v461_v10  ;;  %vm422_vm11 = vcmp.ge.u32.totalorder %v390_v23, 0  ;;  %v454_v25 = vld [vmem:[%s1689_s15 + $0xa0] sm:$0xff]  ;;  %v453_v26 = vld [vmem:[%s1689_s15 + $0x98] sm:$0xff]  ;;  %vm421_vm12 = vcmp.ge.u32.totalorder %v389_v24, 0  ;;  %v388_v27 = vld [vmem:[%s1706_s14 + $0x90] sm:$0xff] }
  0x8f   : > { %v515_v28 = vld [vmem:[%s1681_s8 + $0x8] sm:$0xff]  ;;  %vm420_vm13 = vcmp.ge.u32.totalorder %v388_v27, 0  ;;  %v452_v31 = vld [vmem:[%s1689_s15 + $0x90] sm:$0xff]  ;;  %v386_v33 = vld [vmem:[%s1706_s14 + $0x80] sm:$0xff] }
  0x90   : > { %v531_v29 = vld [vmem:[%s1681_s8 + $0x88] sm:$0xff]  ;;  %610 = vmatprep.mubr.f32.mxu0 %v515_v28  ;;  %v385_v34 = vld [vmem:[%s1706_s14 + $0x78] sm:$0xff]  ;;  %vm418_vm15 = vcmp.ge.u32.totalorder %v386_v33, 0  ;;  %v450_v35 = vld [vmem:[%s1689_s15 + $0x80] sm:$0xff] }
  0x91   : > { %976 = vmatpush1.xpose.msk.msra.mxu0 %vm428_vm5, %v460_v13  ;;  %1030 = vmatpush1.xpose.msk.msra.mxu1 %vm428_vm5, %v460_v13  ;;  %v387_v30 = vld [vmem:[%s1706_s14 + $0x88] sm:$0xff]  ;;  %vm417_vm0 = vcmp.ge.u32.totalorder %v385_v34, 0  ;;  %v449_v36 = vld [vmem:[%s1689_s15 + $0x78] sm:$0xff]  ;;  %v384_v37 = vld [vmem:[%s1706_s14 + $0x70] sm:$0xff] }
  0x92   : > { %977 = vmatprep.subr.msk.mxu0 %vm427_vm6, %v459_v14  ;;  %1015 = vmatprep.subr.msk.mxu1 %vm427_vm6, %v459_v14  ;;  %vm419_vm14 = vcmp.ge.u32.totalorder %v387_v30, 0  ;;  %v451_v32 = vld [vmem:[%s1689_s15 + $0x88] sm:$0xff]  ;;  %vm416_vm1 = vcmp.ge.u32.totalorder %v384_v37, 0  ;;  %v448_v39 = vld [vmem:[%s1689_s15 + $0x70] sm:$0xff]  ;;  %v382_v41 = vld [vmem:[%s1706_s14 + $0x60] sm:$0xff] }
  0x93   : > { %650 = vmatprep.mubr.f32.mxu1 %v531_v29  ;;  %v383_v38 = vld [vmem:[%s1706_s14 + $0x68] sm:$0xff]  ;;  %v381_v42 = vld [vmem:[%s1706_s14 + $0x58] sm:$0xff]  ;;  %vm414_vm3 = vcmp.ge.u32.totalorder %v382_v41, 0  ;;  %v446_v43 = vld [vmem:[%s1689_s15 + $0x60] sm:$0xff] }
  0x94   : > { %vm415_vm2 = vcmp.ge.u32.totalorder %v383_v38, 0  ;;  %v447_v40 = vld [vmem:[%s1689_s15 + $0x68] sm:$0xff]  ;;  %vm413_vm4 = vcmp.ge.u32.totalorder %v381_v42, 0  ;;  %v445_v44 = vld [vmem:[%s1689_s15 + $0x58] sm:$0xff]  ;;  %v380_v45 = vld [vmem:[%s1706_s14 + $0x50] sm:$0xff] }
  0x95   : > { %978 = vmatpush1.xpose.msk.msra.mxu0 %vm426_vm7, %v458_v17  ;;  %1031 = vmatpush1.xpose.msk.msra.mxu1 %vm426_vm7, %v458_v17  ;;  %v379_v46 = vld [vmem:[%s1706_s14 + $0x48] sm:$0xff]  ;;  %vm412_vm5 = vcmp.ge.u32.totalorder %v380_v45, 0  ;;  %v444_v47 = vld [vmem:[%s1689_s15 + $0x50] sm:$0xff]  ;;  %v378_v49 = vld [vmem:[%s1706_s14 + $0x40] sm:$0xff] }
  0x96   : > { %979 = vmatprep.subr.msk.mxu0 %vm425_vm8, %v457_v18  ;;  %1016 = vmatprep.subr.msk.mxu1 %vm425_vm8, %v457_v18  ;;  %vm411_vm6 = vcmp.ge.u32.totalorder %v379_v46, 0  ;;  %v443_v48 = vld [vmem:[%s1689_s15 + $0x48] sm:$0xff]  ;;  %v377_v50 = vld [vmem:[%s1706_s14 + $0x38] sm:$0xff]  ;;  %vm410_vm7 = vcmp.ge.u32.totalorder %v378_v49, 0  ;;  %v442_v51 = vld [vmem:[%s1689_s15 + $0x40] sm:$0xff] }
  0x97   : > { %vm409_vm8 = vcmp.ge.u32.totalorder %v377_v50, 0  ;;  %v441_v52 = vld [vmem:[%s1689_s15 + $0x38] sm:$0xff]  ;;  %v376_v53 = vld [vmem:[%s1706_s14 + $0x30] sm:$0xff]  ;;  %v375_v54 = vld [vmem:[%s1706_s14 + $0x28] sm:$0xff] }
  0x98   : > { %v440_v55 = vld [vmem:[%s1689_s15 + $0x30] sm:$0xff]  ;;  %v439_v56 = vld [vmem:[%s1689_s15 + $0x28] sm:$0xff]  ;;  %v374_v57 = vld [vmem:[%s1706_s14 + $0x20] sm:$0xff] }
  0x99   : > { %980 = vmatpush1.xpose.msk.msra.mxu0 %vm424_vm9, %v456_v21  ;;  %1032 = vmatpush1.xpose.msk.msra.mxu1 %vm424_vm9, %v456_v21  ;;  %vm408_vm9 = vcmp.ge.u32.totalorder %v376_v53, 0  ;;  %v373_v58 = vld [vmem:[%s1706_s14 + $0x18] sm:$0xff]  ;;  %v438_v59 = vld [vmem:[%s1689_s15 + $0x20] sm:$0xff]  ;;  %v372_v61 = vld [vmem:[%s1706_s14 + $0x10] sm:$0xff] }
  0x9a   : > { %981 = vmatprep.subr.msk.mxu0 %vm423_vm10, %v455_v22  ;;  %1017 = vmatprep.subr.msk.mxu1 %vm423_vm10, %v455_v22  ;;  %vm407_vm10 = vcmp.ge.u32.totalorder %v375_v54, 0  ;;  %v437_v60 = vld [vmem:[%s1689_s15 + $0x18] sm:$0xff]  ;;  %v371_v62 = vld [vmem:[%s1706_s14 + $0x8] sm:$0xff]  ;;  %v436_v63 = vld [vmem:[%s1689_s15 + $0x10] sm:$0xff] }
  0x9b   : > { %v435_v0 = vld [vmem:[%s1689_s15 + $0x8] sm:$0xff]  ;;  %v370_v1 = vld [vmem:[%s1706_s14] sm:$0xff]  ;;  %v517_v5 = vld [vmem:[%s1681_s8 + $0x18] sm:$0xff] }
  0x9c   : > { %v434_v2 = vld [vmem:[%s1689_s15] sm:$0xff]  ;;  %v533_v6 = vld [vmem:[%s1681_s8 + $0x98] sm:$0xff]  ;;  %v516_v7 = vld [vmem:[%s1681_s8 + $0x10] sm:$0xff] }
  0x9d   : > { %982 = vmatpush1.xpose.msk.msra.mxu0 %vm422_vm11, %v454_v25  ;;  %1033 = vmatpush1.xpose.msk.msra.mxu1 %vm422_vm11, %v454_v25  ;;  %vm406_vm11 = vcmp.ge.u32.totalorder %v374_v57, 0  ;;  %v514_v3 = vld [vmem:[%s1681_s8] sm:$0xff]  ;;  %v532_v8 = vld [vmem:[%s1681_s8 + $0x90] sm:$0xff]  ;;  %v519_v9 = vld [vmem:[%s1681_s8 + $0x28] sm:$0xff] }
  0x9e   : > { %983 = vmatprep.subr.msk.mxu0 %vm421_vm12, %v453_v26  ;;  %1018 = vmatprep.subr.msk.mxu1 %vm421_vm12, %v453_v26  ;;  %vm405_vm12 = vcmp.ge.u32.totalorder %v373_v58, 0  ;;  %v530_v4 = vld [vmem:[%s1681_s8 + $0x80] sm:$0xff]  ;;  %v535_v10 = vld [vmem:[%s1681_s8 + $0xa8] sm:$0xff]  ;;  %v521_v13 = vld [vmem:[%s1681_s8 + $0x38] sm:$0xff] }
  0x9f   : > { %v518_v11 = vld [vmem:[%s1681_s8 + $0x20] sm:$0xff]  ;;  %v537_v14 = vld [vmem:[%s1681_s8 + $0xb8] sm:$0xff]  ;;  %v520_v15 = vld [vmem:[%s1681_s8 + $0x30] sm:$0xff] }
  0xa0   : > { %v534_v12 = vld [vmem:[%s1681_s8 + $0xa0] sm:$0xff]  ;;  %v536_v16 = vld [vmem:[%s1681_s8 + $0xb0] sm:$0xff]  ;;  %v523_v17 = vld [vmem:[%s1681_s8 + $0x48] sm:$0xff] }
  0xa1   : > { %984 = vmatpush1.xpose.msk.msra.mxu0 %vm420_vm13, %v452_v31  ;;  %1034 = vmatpush1.xpose.msk.msra.mxu1 %vm420_vm13, %v452_v31  ;;  %vm404_vm13 = vcmp.ge.u32.totalorder %v372_v61, 0  ;;  %v539_v18 = vld [vmem:[%s1681_s8 + $0xc8] sm:$0xff]  ;;  %v522_v19 = vld [vmem:[%s1681_s8 + $0x40] sm:$0xff]  ;;  %v525_v21 = vld [vmem:[%s1681_s8 + $0x58] sm:$0xff] }
  0xa2   : > { %985 = vmatprep.subr.msk.mxu0 %vm419_vm14, %v451_v32  ;;  %1019 = vmatprep.subr.msk.mxu1 %vm419_vm14, %v451_v32  ;;  %vm403_vm14 = vcmp.ge.u32.totalorder %v371_v62, 0  ;;  %v538_v20 = vld [vmem:[%s1681_s8 + $0xc0] sm:$0xff]  ;;  %v541_v22 = vld [vmem:[%s1681_s8 + $0xd8] sm:$0xff]  ;;  %v524_v23 = vld [vmem:[%s1681_s8 + $0x50] sm:$0xff] }
  0xa3   : > { %v540_v24 = vld [vmem:[%s1681_s8 + $0xd0] sm:$0xff]  ;;  %v527_v25 = vld [vmem:[%s1681_s8 + $0x68] sm:$0xff]  ;;  %v526_v27 = vld [vmem:[%s1681_s8 + $0x60] sm:$0xff] }
  0xa4   : > { %v543_v26 = vld [vmem:[%s1681_s8 + $0xe8] sm:$0xff]  ;;  %v542_v28 = vld [vmem:[%s1681_s8 + $0xe0] sm:$0xff]  ;;  %v529_v29 = vld [vmem:[%s1681_s8 + $0x78] sm:$0xff] }
  0xa5   : > { %986 = vmatpush1.xpose.msk.msra.mxu0 %vm418_vm15, %v450_v35  ;;  %1035 = vmatpush1.xpose.msk.msra.mxu1 %vm418_vm15, %v450_v35  ;;  %vm402_vm15 = vcmp.ge.u32.totalorder %v370_v1, 0  ;;  %v545_v30 = vld [vmem:[%s1681_s8 + $0xf8] sm:$0xff]  ;;  %v528_v31 = vld [vmem:[%s1681_s8 + $0x70] sm:$0xff]  ;;  %v506_v34 = vld [vmem:[#allocation2 + $0x40] sm:$0xff] }
  0xa6   : > { %987 = vmatprep.subr.msk.mxu0 %vm417_vm0, %v449_v36  ;;  %1020 = vmatprep.subr.msk.mxu1 %vm417_vm0, %v449_v36  ;;  %v544_v32 = vld [vmem:[%s1681_s8 + $0xf0] sm:$0xff]  ;;  %v499_v41 = vld [vmem:[#allocation2] sm:$0xff]  ;;  %v500_v49 = vld [vmem:[#allocation2 + $0x58] sm:$0xff] }
  0xa7   : > { %v498_v33 = vld [vmem:[#allocation2 + $0x30] sm:$0xff]  ;;  %v507_v42 = vld [vmem:[#allocation2 + $0x20] sm:$0xff]  ;;  %v501_v57 = vld [vmem:[#allocation2 + $0x18] sm:$0xff] }
  0xa8   : > { %v508_v50 = vld [vmem:[#allocation2 + $0x10] sm:$0xff]  ;;  %v509_v58 = vld [vmem:[#allocation2 + $0x38] sm:$0xff] }
  0xa9   : > { %988 = vmatpush1.xpose.msk.msra.mxu0 %vm416_vm1, %v448_v39  ;;  %1036 = vmatpush1.xpose.msk.msra.mxu1 %vm416_vm1, %v448_v39  ;;  %v502_v1 = vld [vmem:[#allocation2 + $0x50] sm:$0xff] }
  0xaa   : > { %989 = vmatprep.subr.msk.mxu0 %vm415_vm2, %v447_v40  ;;  %1021 = vmatprep.subr.msk.mxu1 %vm415_vm2, %v447_v40 }
  0xad   : > { %990 = vmatpush1.xpose.msk.msra.mxu0 %vm414_vm3, %v446_v43  ;;  %1037 = vmatpush1.xpose.msk.msra.mxu1 %vm414_vm3, %v446_v43 }
  0xae   : > { %991 = vmatprep.subr.msk.mxu0 %vm413_vm4, %v445_v44  ;;  %1022 = vmatprep.subr.msk.mxu1 %vm413_vm4, %v445_v44 }
  0xb1   : > { %992 = vmatpush1.xpose.msk.msra.mxu0 %vm412_vm5, %v444_v47  ;;  %1038 = vmatpush1.xpose.msk.msra.mxu1 %vm412_vm5, %v444_v47 }
  0xb2   : > { %993 = vmatprep.subr.msk.mxu0 %vm411_vm6, %v443_v48  ;;  %1023 = vmatprep.subr.msk.mxu1 %vm411_vm6, %v443_v48 }
  0xb5   : > { %994 = vmatpush1.xpose.msk.msra.mxu0 %vm410_vm7, %v442_v51  ;;  %1039 = vmatpush1.xpose.msk.msra.mxu1 %vm410_vm7, %v442_v51 }
  0xb6   : > { %995 = vmatprep.subr.msk.mxu0 %vm409_vm8, %v441_v52  ;;  %1024 = vmatprep.subr.msk.mxu1 %vm409_vm8, %v441_v52 }
  0xb9   : > { %996 = vmatpush1.xpose.msk.msra.mxu0 %vm408_vm9, %v440_v55  ;;  %1040 = vmatpush1.xpose.msk.msra.mxu1 %vm408_vm9, %v440_v55 }
  0xba   : > { %997 = vmatprep.subr.msk.mxu0 %vm407_vm10, %v439_v56  ;;  %1025 = vmatprep.subr.msk.mxu1 %vm407_vm10, %v439_v56 }
  0xbd   : > { %998 = vmatpush1.xpose.msk.msra.mxu0 %vm406_vm11, %v438_v59  ;;  %1041 = vmatpush1.xpose.msk.msra.mxu1 %vm406_vm11, %v438_v59 }
  0xbe   : > { %999 = vmatprep.subr.msk.mxu0 %vm405_vm12, %v437_v60  ;;  %1026 = vmatprep.subr.msk.mxu1 %vm405_vm12, %v437_v60 }
  0xc1   : > { %1000 = vmatpush1.xpose.msk.msra.mxu0 %vm404_vm13, %v436_v63  ;;  %1042 = vmatpush1.xpose.msk.msra.mxu1 %vm404_vm13, %v436_v63 }
  0xc2   : > { %1001 = vmatprep.subr.msk.mxu0 %vm403_vm14, %v435_v0  ;;  %1027 = vmatprep.subr.msk.mxu1 %vm403_vm14, %v435_v0 }
  0xc5   : > { %1002 = vmatpush1.xpose.msk.msra.mxu0 %vm402_vm15, %v434_v2  ;;  %1043 = vmatpush1.xpose.msk.msra.mxu1 %vm402_vm15, %v434_v2  ;;  %v510_v2 = vld [vmem:[#allocation2 + $0x60] sm:$0xff] }
  0xc8   : > { %611 = vmatmul.mubr.f32.vlgmr.msra.gmra.mxu0 %v514_v3  ;;  %651 = vmatmul.mubr.f32.vlgmr.msra.gmra.mxu1 %v530_v4 }
  0xc9   : > { %615 = vmatprep.mubr.f32.mxu0 %v517_v5  ;;  %655 = vmatprep.mubr.f32.mxu1 %v533_v6 }
  0xcc   : > { %616 = vmatmul.mubr.f32.gmra.mxu0 %v516_v7  ;;  %656 = vmatmul.mubr.f32.gmra.mxu1 %v532_v8 }
  0xcd   : > { %620 = vmatprep.mubr.f32.mxu0 %v519_v9  ;;  %660 = vmatprep.mubr.f32.mxu1 %v535_v10  ;;  %v503_v9 = vld [vmem:[#allocation2 + $0x68] sm:$0xff]  ;;  %v511_v10 = vld [vmem:[#allocation2 + $0x70] sm:$0xff] }
  0xd0   : > { %621 = vmatmul.mubr.f32.gmra.mxu0 %v518_v11  ;;  %661 = vmatmul.mubr.f32.gmra.mxu1 %v534_v12 }
  0xd1   : > { %625 = vmatprep.mubr.f32.mxu0 %v521_v13  ;;  %665 = vmatprep.mubr.f32.mxu1 %v537_v14 }
  0xd4   : > { %626 = vmatmul.mubr.f32.gmra.mxu0 %v520_v15  ;;  %666 = vmatmul.mubr.f32.gmra.mxu1 %v536_v16 }
  0xd5   : > { %630 = vmatprep.mubr.f32.mxu0 %v523_v17  ;;  %670 = vmatprep.mubr.f32.mxu1 %v539_v18  ;;  %v504_v17 = vld [vmem:[#allocation2 + $0x8] sm:$0xff]  ;;  %v512_v18 = vld [vmem:[#allocation2 + $0x78] sm:$0xff] }
  0xd8   : > { %631 = vmatmul.mubr.f32.gmra.mxu0 %v522_v19  ;;  %671 = vmatmul.mubr.f32.gmra.mxu1 %v538_v20 }
  0xd9   : > { %635 = vmatprep.mubr.f32.mxu0 %v525_v21  ;;  %675 = vmatprep.mubr.f32.mxu1 %v541_v22 }
  0xdc   : > { %636 = vmatmul.mubr.f32.gmra.mxu0 %v524_v23  ;;  %676 = vmatmul.mubr.f32.gmra.mxu1 %v540_v24 }
  0xdd   : > { %640 = vmatprep.mubr.f32.mxu0 %v527_v25  ;;  %680 = vmatprep.mubr.f32.mxu1 %v543_v26  ;;  %v505_v25 = vld [vmem:[#allocation2 + $0x48] sm:$0xff] }
  0xde   : > { %v513_v26 = vld [vmem:[#allocation2 + $0x28] sm:$0xff] }
  0xe0   : > { %641 = vmatmul.mubr.f32.gmra.mxu0 %v526_v27  ;;  %681 = vmatmul.mubr.f32.gmra.mxu1 %v542_v28 }
  0xe1   : > { %645 = vmatprep.mubr.f32.mxu0 %v529_v29  ;;  %685 = vmatprep.mubr.f32.mxu1 %v545_v30 }
  0xe4   : > { %646 = vmatmul.mubr.f32.gmra.mxu0 %v528_v31  ;;  %686 = vmatmul.mubr.f32.gmra.mxu1 %v544_v32 }
 0x188   : > { %v612_v35 = vpop.f32.mrf.mxu0  ;;  %v652_v36 = vpop.f32.mrf.mxu1 }
 0x189   : > { %v691_v37 = vadd.f32 %v612_v35, %v498_v33  ;;  %v699_v38 = vadd.f32 %v652_v36, %v506_v34 }
 0x18a   : > { %v614_v39 = vpop.f32.mrf.mxu0  ;;  %v654_v40 = vpop.f32.mrf.mxu1 }
 0x18b   : > { %707 = vst [vmem:[#allocation2 + $0x30] sm:$0xff] %v691_v37  ;;  %715 = vst [vmem:[#allocation2 + $0x40] sm:$0xff] %v699_v38 }
 0x18c   : > { %v617_v43 = vpop.f32.mrf.mxu0  ;;  %v657_v44 = vpop.f32.mrf.mxu1 }
 0x18d   : > { %v692_v45 = vadd.f32 %v617_v43, %v499_v41  ;;  %v700_v46 = vadd.f32 %v657_v44, %v507_v42 }
 0x18e   : > { %v619_v47 = vpop.f32.mrf.mxu0  ;;  %v659_v48 = vpop.f32.mrf.mxu1 }
 0x18f   : > { %708 = vst [vmem:[#allocation2] sm:$0xff] %v692_v45  ;;  %716 = vst [vmem:[#allocation2 + $0x20] sm:$0xff] %v700_v46 }
 0x190   : > { %v622_v51 = vpop.f32.mrf.mxu0  ;;  %v662_v52 = vpop.f32.mrf.mxu1 }
 0x191   : > { %v693_v53 = vadd.f32 %v622_v51, %v500_v49  ;;  %v701_v54 = vadd.f32 %v662_v52, %v508_v50 }
 0x192   : > { %v624_v55 = vpop.f32.mrf.mxu0  ;;  %v664_v56 = vpop.f32.mrf.mxu1 }
 0x193   : > { %709 = vst [vmem:[#allocation2 + $0x58] sm:$0xff] %v693_v53  ;;  %717 = vst [vmem:[#allocation2 + $0x10] sm:$0xff] %v701_v54 }
 0x194   : > { %v627_v59 = vpop.f32.mrf.mxu0  ;;  %v667_v60 = vpop.f32.mrf.mxu1 }
 0x195   : > { %v694_v61 = vadd.f32 %v627_v59, %v501_v57  ;;  %v702_v62 = vadd.f32 %v667_v60, %v509_v58 }
 0x196   : > { %v629_v63 = vpop.f32.mrf.mxu0  ;;  %v669_v0 = vpop.f32.mrf.mxu1 }
 0x197   : > { %710 = vst [vmem:[#allocation2 + $0x18] sm:$0xff] %v694_v61  ;;  %718 = vst [vmem:[#allocation2 + $0x38] sm:$0xff] %v702_v62 }
 0x198   : > { %v632_v3 = vpop.f32.mrf.mxu0  ;;  %v672_v4 = vpop.f32.mrf.mxu1 }
 0x199   : > { %v695_v5 = vadd.f32 %v632_v3, %v502_v1  ;;  %v703_v6 = vadd.f32 %v672_v4, %v510_v2 }
 0x19a   : > { %v634_v7 = vpop.f32.mrf.mxu0  ;;  %v674_v8 = vpop.f32.mrf.mxu1 }
 0x19b   : > { %711 = vst [vmem:[#allocation2 + $0x50] sm:$0xff] %v695_v5  ;;  %719 = vst [vmem:[#allocation2 + $0x60] sm:$0xff] %v703_v6 }
 0x19c   : > { %v637_v11 = vpop.f32.mrf.mxu0  ;;  %v677_v12 = vpop.f32.mrf.mxu1 }
 0x19d   : > { %v696_v13 = vadd.f32 %v637_v11, %v503_v9  ;;  %v704_v14 = vadd.f32 %v677_v12, %v511_v10 }
 0x19e   : > { %v639_v15 = vpop.f32.mrf.mxu0  ;;  %v679_v16 = vpop.f32.mrf.mxu1 }
 0x19f   : > { %712 = vst [vmem:[#allocation2 + $0x68] sm:$0xff] %v696_v13  ;;  %720 = vst [vmem:[#allocation2 + $0x70] sm:$0xff] %v704_v14 }
 0x1a0   : > { %v642_v19 = vpop.f32.mrf.mxu0  ;;  %v682_v20 = vpop.f32.mrf.mxu1 }
 0x1a1   : > { %v697_v21 = vadd.f32 %v642_v19, %v504_v17  ;;  %v705_v22 = vadd.f32 %v682_v20, %v512_v18 }
 0x1a2   : > { %v644_v23 = vpop.f32.mrf.mxu0  ;;  %v684_v24 = vpop.f32.mrf.mxu1 }
 0x1a3   : > { %713 = vst [vmem:[#allocation2 + $0x8] sm:$0xff] %v697_v21  ;;  %721 = vst [vmem:[#allocation2 + $0x78] sm:$0xff] %v705_v22  ;;  %726 = sbr.rel (%p1003_p6) target bundleno = 435 (0x1b3), region = 56 }
 0x1a4   : > { %v647_v27 = vpop.f32.mrf.mxu0  ;;  %v687_v28 = vpop.f32.mrf.mxu1 }
 0x1a5   : > { %v698_v29 = vadd.f32 %v647_v27, %v505_v25  ;;  %v706_v30 = vadd.f32 %v687_v28, %v513_v26 }
 0x1a6   : > { %v649_v31 = vpop.f32.mrf.mxu0  ;;  %v689_v32 = vpop.f32.mrf.mxu1 }
 0x1a7   : > { %714 = vst [vmem:[#allocation2 + $0x48] sm:$0xff] %v698_v29  ;;  %722 = vst [vmem:[#allocation2 + $0x28] sm:$0xff] %v706_v30 }
 0x1a8   : > { %v727_v33 = vld [vmem:[#allocation2 + $0x30] sm:$0xff]  ;;  %v1004_v34 = vld [vmem:[%s348_s21] ss:$0 sm:$0xff]  ;;  %v729_v38 = vld [vmem:[#allocation2 + $0x58] sm:$0xff] }
 0x1a9   : > { %v728_v35 = vld [vmem:[#allocation2] sm:$0xff]  ;;  %v750_v36 = vadd.f32 %v1004_v34, %v727_v33  ;;  %v730_v39 = vld [vmem:[#allocation2 + $0x18] sm:$0xff]  ;;  %v731_v40 = vld [vmem:[#allocation2 + $0x50] sm:$0xff]  ;;  %v752_v41 = vadd.f32 %v1004_v34, %v729_v38 }
 0x1aa   : > { %v751_v37 = vadd.f32 %v1004_v34, %v728_v35  ;;  %v753_v42 = vadd.f32 %v1004_v34, %v730_v39  ;;  %v754_v43 = vadd.f32 %v1004_v34, %v731_v40  ;;  %v732_v44 = vld [vmem:[#allocation2 + $0x68] sm:$0xff]  ;;  %v735_v50 = vld [vmem:[#allocation2 + $0x40] sm:$0xff]  ;;  %v737_v52 = vld [vmem:[#allocation2 + $0x10] sm:$0xff] }
 0x1ab   : > { %v733_v45 = vld [vmem:[#allocation2 + $0x8] sm:$0xff]  ;;  %766 = vst [vmem:[%s1708_s12] sm:$0xff] %v750_v36  ;;  %v755_v47 = vadd.f32 %v1004_v34, %v732_v44  ;;  %v736_v51 = vld [vmem:[#allocation2 + $0x20] sm:$0xff]  ;;  %768 = vst [vmem:[%s1708_s12 + $0x10] sm:$0xff] %v752_v41  ;;  %v758_v53 = vadd.f32 %v1004_v34, %v735_v50  ;;  %v760_v55 = vadd.f32 %v1004_v34, %v737_v52 }
 0x1ac   : > { %767 = vst [vmem:[%s1708_s12 + $0x8] sm:$0xff] %v751_v37  ;;  %v756_v48 = vadd.f32 %v1004_v34, %v733_v45  ;;  %769 = vst [vmem:[%s1708_s12 + $0x18] sm:$0xff] %v753_v42  ;;  %v759_v54 = vadd.f32 %v1004_v34, %v736_v51  ;;  %v738_v56 = vld [vmem:[#allocation2 + $0x38] sm:$0xff]  ;;  %v739_v57 = vld [vmem:[#allocation2 + $0x60] sm:$0xff] }
 0x1ad   : > { %770 = vst [vmem:[%s1708_s12 + $0x20] sm:$0xff] %v754_v43  ;;  %v740_v58 = vld [vmem:[#allocation2 + $0x70] sm:$0xff]  ;;  %771 = vst [vmem:[%s1708_s12 + $0x28] sm:$0xff] %v755_v47  ;;  %v761_v59 = vadd.f32 %v1004_v34, %v738_v56  ;;  %v762_v60 = vadd.f32 %v1004_v34, %v739_v57  ;;  %v741_v62 = vld [vmem:[#allocation2 + $0x78] sm:$0xff] }
 0x1ae   : > { %v734_v46 = vld [vmem:[#allocation2 + $0x48] sm:$0xff]  ;;  %772 = vst [vmem:[%s1708_s12 + $0x30] sm:$0xff] %v756_v48  ;;  %v763_v61 = vadd.f32 %v1004_v34, %v740_v58  ;;  %774 = vst [vmem:[%s1708_s12 + $0x40] sm:$0xff] %v758_v53  ;;  %v764_v0 = vadd.f32 %v1004_v34, %v741_v62 }
 0x1af   : > { %v757_v49 = vadd.f32 %v1004_v34, %v734_v46  ;;  %v742_v63 = vld [vmem:[#allocation2 + $0x28] sm:$0xff]  ;;  %775 = vst [vmem:[%s1708_s12 + $0x48] sm:$0xff] %v759_v54  ;;  %776 = vst [vmem:[%s1708_s12 + $0x50] sm:$0xff] %v760_v55 }
 0x1b0   : > { %v765_v1 = vadd.f32 %v1004_v34, %v742_v63  ;;  %777 = vst [vmem:[%s1708_s12 + $0x58] sm:$0xff] %v761_v59  ;;  %778 = vst [vmem:[%s1708_s12 + $0x60] sm:$0xff] %v762_v60 }
 0x1b1   : > { %773 = vst [vmem:[%s1708_s12 + $0x38] sm:$0xff] %v757_v49  ;;  %779 = vst [vmem:[%s1708_s12 + $0x68] sm:$0xff] %v763_v61 }
 0x1b2   : > { %780 = vst [vmem:[%s1708_s12 + $0x70] sm:$0xff] %v764_v0  ;;  %781 = vst [vmem:[%s1708_s12 + $0x78] sm:$0xff] %v765_v1 }
 0x1b3 PF: > { %s1970_s5 = sld [smem:[#allocation21_spill]]  ;;  %s1006_s0 = sshll.u32 %s1407_s25, 7 }
 0x1b4   : > { %s1971_s18 = sld [smem:[#allocation25_spill]]  ;;  %s798_s15 = sshll.u32 %s1708_s12, 4  ;;  %s1836_s15 = int_to_ptr.vmem [resolvable:$true] %s798_s15 }
 0x1b5   : > { %s1840_s24 = scalar_lea.sflag [#allocation5], %s337_s4  ;;  %s1271_s7 = scalar_lea.vmem %s1836_s15, 2048 }
 0x1b6   : > { %p1272_p9 = scmp.ne.s32.totalorder %s1836_s15, %s1271_s7  ;;  %s1428_s25 = smov [#allocation9]  }
 0x1b7   : > { %s1275_s29 = sshll.u32 %s1428_s25, 4  ;;  %s1276_s29 = int_to_ptr.vmem [resolvable:$false] %s1275_s29 }
 0x1b8   : > { %s1277_s11 = scalar_lea.vmem %s1276_s29, 4096  ;;  %p1278_p1 = scmp.lt.s32.totalorder %s1836_s15, %s1276_s29 }
 0x1b9   : > { %p1973_p10 = scmp.ne.s32.totalorder %s1970_s5, 0  ;;  %p1279_p8 = scmp.lt.s32.totalorder %s1277_s11, %s1271_s7 }
 0x1ba   : > { %s1972_s13 = smov %s1971_s18  ;;  %s1833_s17 = scalar_lea.hbm %s1971_s18, %s1006_s0 }
 0x1bb   : > { %p1273_p3 = pnand %p1272_p9, %p1973_p10  ;;  %p1280_p5 = por %p1279_p8, %p1278_p1 }
 0x1bd   : > { %p1274_p2 = pneg %p1273_p3 }
 0x1bf   : > { %p1281_p4 = pnand %p1280_p5, %p1274_p2 }
 0x1c1   : > { %1284 = shalt.err (!%p1281_p4)
}
 0x1c2   : > { %s1285_s4 = scalar_lea.hbm %s1833_s17, 2048  ;;  %s1289_s12 = scalar_lea.hbm %s1972_s13, 4096 }
 0x1c3   : > { %p1286_p13 = scmp.ne.s32.totalorder %s1833_s17, %s1285_s4  ;;  %p1290_p12 = scmp.lt.s32.totalorder %s1833_s17, %s1972_s13 }
 0x1c4   : > { %p1291_p7 = scmp.lt.s32.totalorder %s1289_s12, %s1285_s4 }
 0x1c5   : > { %p1287_p11 = pnand %p1286_p13, %p1973_p10 }
 0x1c6   : > { %p1292_p6 = por %p1291_p7, %p1290_p12 }
 0x1c7   : > { %p1288_p0 = pneg %p1287_p11 }
 0x1c9   : > { %p1293_p9 = pnand %p1292_p6, %p1288_p0 }
 0x1cb   : > { %1296 = shalt.err (!%p1293_p9)
}
 0x1cc   : > { %s1429_s1 = smov 128   ;;  %s1430_s27 = smov 256  }
 0x1cd   : > { %s1431_s0 = smov 8  }
 0x1ce   : > { %1050 = dma.vmem_to_hbm [thread:$0]  (%p1973_p10), %s1836_s15, 2048, %s1833_s17, %s1840_s24, %s1429_s1, %s1430_s27, %s1431_s0  }
 0x1cf PF: > { %s1974_s8 = sld [smem:[#allocation13_spill]]  ;;  %p1067_p3 = scmp.ge.s32.totalorder %s1419_s28, 2 }
 0x1d0   : > { %s1975_s6 = sld [smem:[#allocation22_spill]] }
 0x1d5   : > { %s813_s18 = sand.u32 1, %s1974_s8  }
 0x1d6   : > { %p1976_p2 = scmp.ne.s32.totalorder %s1975_s6, 0  ;;  %s814_s7 = scalar_lea.sflag [#allocation5], %s813_s18 }
 0x1d8   : > { %p1063_p1 = pnand %p1067_p3, %p1976_p2 }
 0x1da   : > { %p1064_p8 = pneg %p1063_p1 }
 0x1dc   : > { %1362 = dma.done.wait (%p1064_p8), %s814_s7, 2048  }
 0x1dd   : > { %1364 = vsyncadd (%p1064_p8), %s814_s7, 4294965248  ;;  %s23_s28 = sadd.s32 1, %s1419_s28   ;;  %s1978_s5 = sld [smem:[#allocation14_spill]] }
 0x1de   : > { %p1868_p5 = scmp.ge.s32.totalorder %s23_s28, 6   ;;  %s1979_s17 = sld [smem:[#allocation19_spill]] }
 0x1df   : > { %s1980_s24 = sld [smem:[#allocation20_spill]]  ;;  %s1985_s15 = smov %s1371_s16 }
 0x1e0   : > { %s1981_s29 = sld [smem:[#allocation16_spill]]  ;;  %s1987_s18 = smov %s1383_s19 }
 0x1e1   : > { %s1982_s11 = sld [smem:[#allocation17_spill]]  ;;  %s1988_s19 = smov %s1387_s20 }
 0x1e2   : > { %s1983_s27 = sld [smem:[#allocation18_spill]]  ;;  %s1990_s21 = smov %s1395_s22 }
 0x1e3   : > { %s1986_s16 = smov %s1978_s5  ;;  %s1991_s22 = smov %s1399_s23 }
 0x1e4   : > { %s1992_s23 = smov %s1632_s9  ;;  %22 = sbr.rel (!%p1868_p5) target bundleno = 16 (0x10), region = 116 }
 0x1e5   : > { %s1989_s20 = smov %s1980_s24  ;;  %s1993_s24 = smov %s1411_s26 }
 0x1e6   : > { %s1994_s25 = smov %s1981_s29 }
 0x1e7   : > { %s1995_s26 = smov %s1982_s11 }
 0x1e9   :  { %819 = vsyncpa [#allocation4], 1 }
 0x1ea   :  { %821 = vsyncpa [#allocation4 + $0x1], 1 }
 0x1eb   :  { %822 = vsyncpa [#allocation7], 1 }
 0x1ec   :  { %824 = vsyncpa [#allocation7 + $0x1], 1 }
 0x1ed   :  { %825 = vsyncpa [#allocation5], 1 }
 0x1ee   :  { %827 = vsyncpa [#allocation5 + $0x1], 1 }

</bundles_post_ra>
